<compile_context>
chip_gen: v7x
topology: tpu7x:2x2x1
jax: 0.10.0
libtpu: 0.0.40
codegen_flags: <defaults>
</compile_context>

<pallas_src>
import functools

import jax
import jax.numpy as jnp
from jax.experimental import pallas as pl
from jax.experimental.pallas import tpu as pltpu


def _shortcut_kernel(x_ref, sel_ref, o_ref, *, c_in, pad):
    # x_ref:   (NB, C, H*W)       contiguous NCHW block, spatial dims merged
    # sel_ref: (H*W, Ho*Wo)       one-hot selection matrix (even h, even w)
    # o_ref:   (NB, Cout, Ho*Wo)  Cout = C + 2*pad
    nb = x_ref.shape[0]
    sel = sel_ref[...]

    # Zero the whole output block once; this covers the 2*pad zero channels.
    o_ref[...] = jnp.zeros(o_ref.shape, o_ref.dtype)

    # Per image: a single MXU matmul performs the full stride-2 spatial
    # subsample; a direct sliced store places it at channel offset `pad`.
    for b in range(nb):  # static unroll; NB is kept small
        sub = jnp.dot(x_ref[b], sel, preferred_element_type=jnp.float32)
        o_ref[b, pad:pad + c_in, :] = sub.astype(o_ref.dtype)


def _pick_batch_block(n, c, hw, itemsize, *, max_unroll=16, target_bytes=2 << 20):
    """Largest divisor of n that keeps the input block around `target_bytes`,
    bounds the static unroll, and leaves >= 2 grid steps (v7x has 2 TCs)."""
    per_image = max(1, c * hw * itemsize)
    cap = max(1, min(max_unroll, target_bytes // per_image))
    if n >= 2:
        cap = min(cap, n // 2)
    nb = 1
    for d in range(1, int(cap) + 1):
        if n % d == 0:
            nb = d
    return nb


def lambda_layer(x_nchw, planes):
    """Pallas equivalent of F.pad(x[:, :, ::2, ::2], (0,0,0,0,planes//4,planes//4))."""
    N, C, H, W = x_nchw.shape
    assert H % 2 == 0 and W % 2 == 0, "even spatial dims expected"
    pad = planes // 4
    Ho, Wo = H // 2, W // 2
    Cout = C + 2 * pad
    HW, HoWo = H * W, Ho * Wo

    # Free reshape only (no transpose): merge spatial dims into the lane axis.
    x3 = x_nchw.reshape(N, C, HW)

    # One-hot selection: sel[h*W + w, i*Wo + j] = (h == 2i) & (w == 2j).
    q = jnp.arange(HW, dtype=jnp.int32)[:, None]
    p = jnp.arange(HoWo, dtype=jnp.int32)[None, :]
    sel = (((q // W) == 2 * (p // Wo)) & ((q % W) == 2 * (p % Wo)))
    sel = sel.astype(x_nchw.dtype)

    NB = _pick_batch_block(N, C, HW, x_nchw.dtype.itemsize)

    out3 = pl.pallas_call(
        functools.partial(_shortcut_kernel, c_in=C, pad=pad),
        out_shape=jax.ShapeDtypeStruct((N, Cout, HoWo), x_nchw.dtype),
        grid=(N // NB,),
        in_specs=[
            pl.BlockSpec((NB, C, HW), lambda i: (i, 0, 0)),
            # Constant block index -> fetched once, stays resident in VMEM.
            pl.BlockSpec((HW, HoWo), lambda i: (0, 0)),
        ],
        out_specs=pl.BlockSpec((NB, Cout, HoWo), lambda i: (i, 0, 0)),
        compiler_params=pltpu.CompilerParams(
            dimension_semantics=("parallel",)),
    )(x3, sel)

    # Free reshape back to NCHW.
    return out3.reshape(N, Cout, Ho, Wo)


if __name__ == "__main__":
    key = jax.random.PRNGKey(0)
    x = jax.random.normal(key, (2, 4, 16, 16), dtype=jnp.float32)
    planes = 8  # -> pad = planes // 4 = 2 zero channels on each side

    out = jax.jit(lambda_layer, static_argnums=1)(x, planes)
    out = jax.block_until_ready(out)

    # pure-JAX reference of the PyTorch lambda
    pad = planes // 4
    ref = jnp.pad(x[:, :, ::2, ::2], ((0, 0), (pad, pad), (0, 0), (0, 0)))

    assert out.shape == ref.shape == (2, 8, 8, 8), out.shape
    assert out.dtype == ref.dtype
    assert jnp.allclose(out, ref), "mismatch vs reference"
    print("KERNEL_OK")
</pallas_src>

<mosaic_0001>
module attributes {stable_mosaic.version = 11 : i64} {
  func.func @_shortcut_kernel(%arg0: i32, %arg1: memref<1x4x256xf32, #tpu.memory_space<vmem>>, %arg2: memref<256x64xf32, #tpu.memory_space<vmem>>, %arg3: memref<1x8x64xf32, #tpu.memory_space<vmem>>) attributes {dimension_semantics = [#tpu.dimension_semantics<parallel>], iteration_bounds = array<i64: 2>, scalar_prefetch = 0 : i64, scratch_operands = 0 : i64, tpu.core_type = #tpu.core_type<tc>, window_params = [{transform_indices = @transform_0, window_bounds = array<i64: 1, 4, 256>}, {pipeline_mode = #tpu.pipeline_mode<synchronous>, transform_indices = @transform_1, window_bounds = array<i64: 256, 64>}, {transform_indices = @transform_2, window_bounds = array<i64: 1, 8, 64>}]} {
    %c0 = arith.constant 0 : index
    %c0_0 = arith.constant 0 : index
    %0 = vector.load %arg2[%c0, %c0_0] : memref<256x64xf32, #tpu.memory_space<vmem>>, vector<256x64xf32>
    %cst = arith.constant 0.000000e+00 : f32
    %1 = vector.broadcast %cst : f32 to vector<1x8x64xf32>
    %c0_1 = arith.constant 0 : index
    %c0_2 = arith.constant 0 : index
    %c0_3 = arith.constant 0 : index
    %2 = vector.load %arg3[%c0_1, %c0_2, %c0_3] : memref<1x8x64xf32, #tpu.memory_space<vmem>>, vector<1x8x64xf32>
    tpu.vector_store %arg3[%c0_1, %c0_2, %c0_3], %1 {strides = array<i32>} : memref<1x8x64xf32, #tpu.memory_space<vmem>>, vector<1x8x64xf32>,
    %c0_4 = arith.constant 0 : index
    %c0_5 = arith.constant 0 : index
    %c0_6 = arith.constant 0 : index
    %3 = vector.load %arg1[%c0_4, %c0_5, %c0_6] : memref<1x4x256xf32, #tpu.memory_space<vmem>>, vector<1x4x256xf32>
    %4 = vector.shape_cast %3 : vector<1x4x256xf32> to vector<4x256xf32>
    %cst_7 = arith.constant dense<0.000000e+00> : vector<4x64xf32>
    %5 = tpu.matmul %4, %0, %cst_7 {dimension_numbers = #tpu.dot_dimension_numbers<[1], [0], [0], [1], [0, 0, 1, 1], [], []>} : vector<4x256xf32>, vector<256x64xf32>, vector<4x64xf32> -> vector<4x64xf32>
    %c0_8 = arith.constant 0 : index
    %c2 = arith.constant 2 : index
    %c0_9 = arith.constant 0 : index
    %6 = vector.load %arg3[%c0_8, %c2, %c0_9] : memref<1x8x64xf32, #tpu.memory_space<vmem>>, vector<1x4x64xf32>
    %7 = vector.shape_cast %6 : vector<1x4x64xf32> to vector<4x64xf32>
    %8 = vector.shape_cast %5 : vector<4x64xf32> to vector<1x4x64xf32>
    tpu.vector_store %arg3[%c0_8, %c2, %c0_9], %8 {strides = array<i32>} : memref<1x8x64xf32, #tpu.memory_space<vmem>>, vector<1x4x64xf32>,
    return
  }
  func.func @transform_0(%arg0: i32) -> (i32, i32, i32) {
    %c0_i32 = arith.constant 0 : i32
    %c0_i32_0 = arith.constant 0 : i32
    %c0_i32_1 = arith.constant 0 : i32
    return %arg0, %c0_i32, %c0_i32_0 : i32, i32, i32
  }
  func.func @transform_1(%arg0: i32) -> (i32, i32) {
    %c0_i32 = arith.constant 0 : i32
    %c0_i32_0 = arith.constant 0 : i32
    %c0_i32_1 = arith.constant 0 : i32
    return %c0_i32, %c0_i32_0 : i32, i32
  }
  func.func @transform_2(%arg0: i32) -> (i32, i32, i32) {
    %c0_i32 = arith.constant 0 : i32
    %c0_i32_0 = arith.constant 0 : i32
    %c0_i32_1 = arith.constant 0 : i32
    return %arg0, %c0_i32, %c0_i32_0 : i32, i32, i32
  }
}

</mosaic_0001>

<bundles_post_ra>
// kernel: lambda_layer.1
= control target key start
LH: loop header
LB: loop body
LE: loop exit
PB: predicated region body
PF: predicated region fallthrough
CT: control target
= control target key end

     0   :  { %s417_s9 = smov 0   ;;  %s534_s0 = inlined_call_operand.vmem [shape: f32[2,4,256], index: 0, kind: input, shape index: {}]   ;;  %s535_s1 = inlined_call_operand.vmem [shape: f32[256,64], index: 1, kind: input, shape index: {}]   ;;  %s536_s2 = inlined_call_operand.vmem [shape: f32[2,8,64], index: 2, kind: output, shape index: {}]  }
   0x1 LB: > { %s305_s10 = sadd.s32 4294967295, %s399_s9   ;;  %p309_p0 = scmp.ge.s32.totalorder %s399_s9, 1  ;;  %s399_s9 = sphi %s417_s9, %s12_s9  }
   0x2   : > { %p112_p1 = scmp.lt.s32.totalorder %s399_s9, 3 }
   0x4   : > { %p113_p2 = pnand %p309_p0, %p112_p1 }
   0x5   : > { %v158_v0 = vld [vmem:[%s535_s1 + $0x80] sm:$0xff] (!%p113_p2)  ;;  %v159_v1 = vld [vmem:[%s535_s1 + $0x88] sm:$0xff] (!%p113_p2)  ;;  %p133_p3 = scmp.lt.s32.totalorder (!%p113_p2), %s305_s10, 1  ;;  %v160_v5 = vld [vmem:[%s535_s1 + $0x90] sm:$0xff] (!%p113_p2)  ;;  %vm174_vm0 = vcmask (!%p113_p2), 523264   ;;  %v401_v19 = vmov (!%p113_p2), 0.0  }
   0x6   : > { %116 = sbr.rel (%p113_p2) target bundleno = 256 (0x100), region = 28  ;;  %v142_v2 = vld [vmem:[%s535_s1] sm:$0xff] (!%p113_p2)  ;;  %v351_v3 = vpack.c.bf16 (!%p113_p2), %v159_v1, %v158_v0  ;;  %v143_v4 = vld [vmem:[%s535_s1 + $0x8] sm:$0xff] (!%p113_p2)  ;;  %v161_v6 = vld [vmem:[%s535_s1 + $0x98] sm:$0xff] (!%p113_p2)  ;;  %vm250_vm1 = vcmask (!%p113_p2), 519168  }
   0x7   : > { %v353_v7 = vpack.c.bf16 (!%p113_p2), %v143_v4, %v142_v2  ;;  %v355_v8 = vpack.c.bf16 (!%p113_p2), %v161_v6, %v160_v5  ;;  %v144_v9 = vld [vmem:[%s535_s1 + $0x10] sm:$0xff] (!%p113_p2)  ;;  %v145_v10 = vld [vmem:[%s535_s1 + $0x18] sm:$0xff] (!%p113_p2)  ;;  %v162_v11 = vld [vmem:[%s535_s1 + $0xa0] sm:$0xff] (!%p113_p2) }
   0x8   : > { %352 = vmatprep.subr.bf16.mxu0 (!%p113_p2), %v351_v3  ;;  %v163_v12 = vld [vmem:[%s535_s1 + $0xa8] sm:$0xff] (!%p113_p2)  ;;  %v357_v13 = vpack.c.bf16 (!%p113_p2), %v145_v10, %v144_v9  ;;  %v146_v15 = vld [vmem:[%s535_s1 + $0x20] sm:$0xff] (!%p113_p2)  ;;  %v164_v17 = vld [vmem:[%s535_s1 + $0xb0] sm:$0xff] (!%p113_p2) }
   0x9   : > { %354 = vmatpush3.bf16.msra.mxu0 (!%p113_p2), %v353_v7  ;;  %v359_v14 = vpack.c.bf16 (!%p113_p2), %v163_v12, %v162_v11  ;;  %v147_v16 = vld [vmem:[%s535_s1 + $0x28] sm:$0xff] (!%p113_p2)  ;;  %v165_v18 = vld [vmem:[%s535_s1 + $0xb8] sm:$0xff] (!%p113_p2)  ;;  %v148_v22 = vld [vmem:[%s535_s1 + $0x30] sm:$0xff] (!%p113_p2) }
   0xa   : > { %356 = vmatprep.subr.bf16.mxu0 (!%p113_p2), %v355_v8  ;;  %v361_v20 = vpack.c.bf16 (!%p113_p2), %v147_v16, %v146_v15  ;;  %v363_v21 = vpack.c.bf16 (!%p113_p2), %v165_v18, %v164_v17  ;;  %v149_v23 = vld [vmem:[%s535_s1 + $0x38] sm:$0xff] (!%p113_p2)  ;;  %v166_v24 = vld [vmem:[%s535_s1 + $0xc0] sm:$0xff] (!%p113_p2)  ;;  %v167_v25 = vld [vmem:[%s535_s1 + $0xc8] sm:$0xff] (!%p113_p2) }
   0xb   : > { %v365_v28 = vpack.c.bf16 (!%p113_p2), %v149_v23, %v148_v22  ;;  %v367_v29 = vpack.c.bf16 (!%p113_p2), %v167_v25, %v166_v24  ;;  %v150_v30 = vld [vmem:[%s535_s1 + $0x40] sm:$0xff] (!%p113_p2)  ;;  %v151_v31 = vld [vmem:[%s535_s1 + $0x48] sm:$0xff] (!%p113_p2)  ;;  %v168_v32 = vld [vmem:[%s535_s1 + $0xd0] sm:$0xff] (!%p113_p2) }
   0xc   : > { %v169_v33 = vld [vmem:[%s535_s1 + $0xd8] sm:$0xff] (!%p113_p2)  ;;  %v369_v34 = vpack.c.bf16 (!%p113_p2), %v151_v31, %v150_v30  ;;  %v152_v36 = vld [vmem:[%s535_s1 + $0x50] sm:$0xff] (!%p113_p2)  ;;  %v170_v38 = vld [vmem:[%s535_s1 + $0xe0] sm:$0xff] (!%p113_p2) }
   0xd   : > { %s538_s10 = smov (!%p133_p3, %s305_s10), 1  ;;  %358 = vmatpush3.bf16.msra.mxu0 %v357_v13  ;;  %v371_v35 = vpack.c.bf16 %v169_v33, %v168_v32  ;;  %v153_v37 = vld [vmem:[%s535_s1 + $0x58] sm:$0xff]  ;;  %v171_v39 = vld [vmem:[%s535_s1 + $0xe8] sm:$0xff]  ;;  %v154_v42 = vld [vmem:[%s535_s1 + $0x60] sm:$0xff] }
   0xe   : > { %s315_s3 = sshll.u32 %s538_s10, 3  ;;  %360 = vmatprep.subr.bf16.mxu0 %v359_v14  ;;  %v373_v40 = vpack.c.bf16 %v153_v37, %v152_v36  ;;  %v375_v41 = vpack.c.bf16 %v171_v39, %v170_v38  ;;  %v155_v43 = vld [vmem:[%s535_s1 + $0x68] sm:$0xff]  ;;  %v172_v44 = vld [vmem:[%s535_s1 + $0xf0] sm:$0xff]  ;;  %v173_v45 = vld [vmem:[%s535_s1 + $0xf8] sm:$0xff] }
   0xf   : > { %s464_s12 = scalar_lea.vmem %s536_s2, %s315_s3  ;;  %s137_s18 = scalar_lea.vmem %s534_s0, %s315_s3  ;;  %v377_v46 = vpack.c.bf16 %v155_v43, %v154_v42  ;;  %v379_v47 = vpack.c.bf16 %v173_v45, %v172_v44  ;;  %v156_v48 = vld [vmem:[%s535_s1 + $0x70] sm:$0xff]  ;;  %v157_v49 = vld [vmem:[%s535_s1 + $0x78] sm:$0xff] }
  0x10   : > { %175 = vst.msk [vmem:[%s464_s12] sm:$0xff] %vm174_vm0, %v401_v19  ;;  %v176_v26 = vld [vmem:[%s137_s18] sm:$0xff]  ;;  %v381_v50 = vpack.c.bf16 %v157_v49, %v156_v48 }
  0x11   : > { %v178_v27 = vcombine.high %v176_v26, %v176_v26  ;;  %362 = vmatpush3.bf16.msra.mxu0 %v361_v20 }
  0x12   : > { %364 = vmatprep.subr.bf16.mxu0 %v363_v21 }
  0x13   : > { %244 = vmatprep.mubr.f32.mxu0 %v178_v27 }
  0x15   : > { %366 = vmatpush3.bf16.msra.mxu0 %v365_v28 }
  0x16   : > { %368 = vmatprep.subr.bf16.mxu0 %v367_v29 }
  0x19   : > { %370 = vmatpush3.bf16.msra.mxu0 %v369_v34 }
  0x1a   : > { %372 = vmatprep.subr.bf16.mxu0 %v371_v35 }
  0x1d   : > { %374 = vmatpush3.bf16.msra.mxu0 %v373_v40 }
  0x1e   : > { %376 = vmatprep.subr.bf16.mxu0 %v375_v41 }
  0x21   : > { %378 = vmatpush3.bf16.msra.mxu0 %v377_v46 }
  0x22   : > { %380 = vmatprep.subr.bf16.mxu0 %v379_v47 }
  0x25   : > { %382 = vmatpush3.bf16.msra.mxu0 %v381_v50 }
  0x28   : > { %245 = vmatmul.mubr.f32.vlgmr.msra.gmra.mrb[0].mxu0 %v176_v26 }
  0xfb   : > { %v348_v51 = vpop.f32.mrb[0].mxu0 }
  0xfc   : > { %v349_v52 = vpop.f32.mrb[1].mxu0 }
  0xfd   : > { %v350_v53 = vadd.f32 %v349_v52, %v348_v51 }
  0xff   : > { %251 = vst.msk [vmem:[%s464_s12 + $0x2] sm:$0xf] %vm250_vm1, %v350_v53 }
 0x100 PF: > { %s12_s9 = sadd.s32 1, %s399_s9  }
 0x101   : > { %p9_p4 = scmp.ge.s32.totalorder %s12_s9, 4  }
 0x103   :  { %11 = sbr.rel (!%p9_p4) target bundleno = 1 (0x1), region = 58 }

</bundles_post_ra>
